<compile_context>
chip_gen: v7x
topology: tpu7x:2x2x1
jax: 0.10.0
libtpu: 0.0.40
codegen_flags: <defaults>
</compile_context>

<pallas_src>
import functools

import jax
import jax.numpy as jnp
from jax.experimental import pallas as pl
from jax.experimental.pallas import tpu as pltpu


# ----------------------------- fused TCN kernel --------------------------------
def _tcn_fused_kernel(K, layer_cfgs, p16, x_ref, *refs):
    """Fused forward for all TemporalBlocks on one batch tile.

    refs layout (after x_ref):
      per layer: w1 (K*cin,cout) bf16, b1 (1,cout) f32,
                 w2 (K*cout,cout) bf16, b2 (1,cout) f32,
                 [wd (cin,cout) bf16, bd (1,cout) f32]   # only if cin != cout
      out_ref  : (NB, C_last, L) f32   (lane-dense: L on the lane axis)
      pad_ref  : VMEM scratch (NB, L + p16, C_max) bf16  (causal halo buffer)
    """
    *w_refs, out_ref, pad_ref = refs
    NB, _, L = x_ref.shape

    # Zero the causal halo once per grid step; activations are always stored at
    # row offset p16, so the halo rows stay zero for every layer/conv.
    if p16 > 0:
        pad_ref[:, 0:p16, :] = jnp.zeros((NB, p16, pad_ref.shape[-1]),
                                         pad_ref.dtype)

    def conv_from_pad(cin, cout, d, w_ref, b_ref):
        """Dilated causal conv (already 'chomped') read from the bf16 halo buffer.

        Builds one (NB*L, K*cin) im2col operand from K shifted windows and does a
        SINGLE MXU matmul against the pre-flattened (K*cin, cout) weight.
        """
        cols = []
        for k in range(K):
            s = (K - 1 - k) * d                      # causal right-shift of tap k
            cols.append(pad_ref[:, p16 - s:p16 - s + L, 0:cin])   # (NB, L, cin) bf16
        xk = jnp.concatenate(cols, axis=-1).reshape(NB * L, K * cin)
        return jnp.dot(xk, w_ref[...],
                       preferred_element_type=jnp.float32) + b_ref[...]

    # Input arrives in native (NB, C0, L) f32; transpose to channels-last on the
    # (otherwise idle) XLU slot.  Residuals are carried in f32 between layers.
    h = jnp.transpose(x_ref[...], (0, 2, 1)).astype(jnp.float32)   # (NB, L, C0)

    idx = 0
    for (cin, cout, d, has_down) in layer_cfgs:
        w1, b1, w2, b2 = w_refs[idx:idx + 4]
        idx += 4
        if has_down:
            wd, bd = w_refs[idx:idx + 2]
            idx += 2

        # Stage the layer input once (bf16) for conv1's taps / the downsample.
        pad_ref[:, p16:p16 + L, 0:cin] = h.astype(pad_ref.dtype)

        # conv1 -> chomp -> relu   (dropout1 = identity, inference)
        h1 = jnp.maximum(conv_from_pad(cin, cout, d, w1, b1), 0.0)  # (NB*L,cout) f32

        # Residual path: read the bf16 copy of the layer input BEFORE it is
        # overwritten by h1 below (identity residual stays full f32).
        if has_down:
            xb = pad_ref[:, p16:p16 + L, 0:cin].reshape(NB * L, cin)
            res = jnp.dot(xb, wd[...],
                          preferred_element_type=jnp.float32) + bd[...]
        else:
            res = h.reshape(NB * L, cin)

        # Epilogue store: write relu(conv1) straight into the halo buffer (bf16)
        # so conv2 reads it back without an extra f32 store+load pass.
        pad_ref[:, p16:p16 + L, 0:cout] = (
            h1.reshape(NB, L, cout).astype(pad_ref.dtype))

        # conv2 -> chomp -> relu   (dropout2 = identity, inference)
        h2 = jnp.maximum(conv_from_pad(cout, cout, d, w2, b2), 0.0)

        # residual add + final relu of the block
        h = jnp.maximum(h2 + res, 0.0).reshape(NB, L, cout)

    # Lane-dense output store: put L (>= 128 in real configs) on the lane axis;
    # also matches the PyTorch (N, C, L) layout so no wrapper transpose is needed.
    out_ref[...] = jnp.transpose(h, (0, 2, 1)).astype(out_ref.dtype)


# ------------------------------- wrapper ---------------------------------------
def temporal_conv_net(x_ncl, params, kernel_size, *, compute_dtype=jnp.bfloat16,
                      batch_block=None):
    """x_ncl: (N, C, L) float32 (PyTorch layout) -> (N, C_last, L) float32."""
    N, c0, L = x_ncl.shape
    K = kernel_size
    num_levels = len(params)

    layer_cfgs = []
    flat_w = []
    cin = c0
    for i, (w1, b1, w2, b2, wd, bd) in enumerate(params):
        cout = w1.shape[-1]
        d = 2 ** i
        has_down = wd is not None
        layer_cfgs.append((cin, cout, d, has_down))
        # Pre-flatten conv weights to (K*cin, cout) for the fused im2col matmul.
        flat_w += [w1.reshape(K * cin, cout).astype(compute_dtype),
                   b1.reshape(1, cout).astype(jnp.float32),
                   w2.reshape(K * cout, cout).astype(compute_dtype),
                   b2.reshape(1, cout).astype(jnp.float32)]
        if has_down:
            flat_w += [wd.astype(compute_dtype),
                       bd.reshape(1, cout).astype(jnp.float32)]
        cin = cout
    c_last = cin
    c_max = max([c0] + [cfg[1] for cfg in layer_cfgs])
    p_max = (K - 1) * (2 ** (num_levels - 1))
    # Round the halo up to a multiple of 16 so the bf16 (16,128)-packed store at
    # row offset p16 stays sublane-aligned.
    p16 = ((p_max + 15) // 16) * 16 if p_max > 0 else 0

    weight_bytes = sum(int(a.size) * a.dtype.itemsize for a in flat_w)

    # VMEM sizing: query the chip; fall back to a v7x-safe 64 MiB assumption.
    try:
        vmem_cap = int(pltpu.get_tpu_info().vmem_capacity_bytes)
    except Exception:
        vmem_cap = 64 * 1024 * 1024
    budget = int(0.45 * vmem_cap)
    vmem_limit = min(int(0.75 * vmem_cap), 128 * 1024 * 1024)

    def vmem_est(nb):
        act = nb * L * c_max
        return (2 * nb * c0 * L * 4            # input block f32 (double-buffered)
                + 2 * nb * c_last * L * 4      # output block f32 (double-buffered)
                + nb * (L + p16) * c_max * 2   # bf16 halo scratch
                + 6 * act * 4                  # live f32 intermediates (h/h1/h2/res/y)
                + act * K * 2                  # bf16 im2col operand
                + 2 * weight_bytes)            # weights (conservative)

    if batch_block is None:
        fits = [b for b in range(1, N + 1) if vmem_est(b) <= budget]
        if not fits:
            nb = 1
        else:
            # Keep >= 2 grid steps when possible so v7x can shard the batch axis
            # across its two TensorCores (no-op on v5e/v6e single-TC chips).
            multi = [b for b in fits if pl.cdiv(N, b) >= 2]
            nb = max(multi) if multi else max(fits)
    else:
        nb = batch_block
    num_steps = pl.cdiv(N, nb)
    n_pad = num_steps * nb

    x = x_ncl.astype(jnp.float32)
    if n_pad != N:                      # pad awkward batch sizes instead of nb=1
        x = jnp.pad(x, ((0, n_pad - N), (0, 0), (0, 0)))

    # Weights have a constant index_map -> single-buffer them when supported.
    def _const_spec(shape):
        try:
            return pl.BlockSpec(shape, lambda n: (0, 0),
                                pipeline_mode=pl.Buffered(1))
        except TypeError:               # older BlockSpec without pipeline_mode
            return pl.BlockSpec(shape, lambda n: (0, 0))

    in_specs = [pl.BlockSpec((nb, c0, L), lambda n: (n, 0, 0))]
    in_specs += [_const_spec(tuple(a.shape)) for a in flat_w]
    out_spec = pl.BlockSpec((nb, c_last, L), lambda n: (n, 0, 0))

    flops = 0
    for (ci, co, _d, hd) in layer_cfgs:
        flops += 2 * n_pad * L * (K * ci * co + K * co * co + (ci * co if hd else 0))
    bytes_accessed = (n_pad * L * c0 * 4 + n_pad * L * c_last * 4
                      + weight_bytes)   # constant-index weight blocks DMA'd once

    kernel = functools.partial(_tcn_fused_kernel, K, tuple(layer_cfgs), p16)

    out = pl.pallas_call(
        kernel,
        out_shape=jax.ShapeDtypeStruct((n_pad, c_last, L), jnp.float32),
        grid=(num_steps,),
        in_specs=in_specs,
        out_specs=out_spec,
        scratch_shapes=[pltpu.VMEM((nb, L + p16, c_max), jnp.bfloat16)],
        compiler_params=pltpu.CompilerParams(
            dimension_semantics=("parallel",),        # batch tiles are independent
            vmem_limit_bytes=vmem_limit),
        cost_estimate=pl.CostEstimate(flops=int(flops), transcendentals=0,
                                      bytes_accessed=int(bytes_accessed)),
    )(x, *flat_w)

    return out[:N] if n_pad != N else out             # already (N, C_last, L)


# ------------------------------- init ------------------------------------------
def init_tcn_params(key, num_inputs, num_channels, kernel_size):
    params = []
    for i, cout in enumerate(num_channels):
        cin = num_inputs if i == 0 else num_channels[i - 1]
        key, k1, k2, k3, k4, k5, k6 = jax.random.split(key, 7)
        w1 = 0.01 * jax.random.normal(k1, (kernel_size, cin, cout), jnp.float32)
        b1 = 0.01 * jax.random.normal(k2, (cout,), jnp.float32)
        w2 = 0.01 * jax.random.normal(k3, (kernel_size, cout, cout), jnp.float32)
        b2 = 0.01 * jax.random.normal(k4, (cout,), jnp.float32)
        if cin != cout:
            wd = 0.01 * jax.random.normal(k5, (cin, cout), jnp.float32)
            bd = 0.01 * jax.random.normal(k6, (cout,), jnp.float32)
        else:
            wd, bd = None, None
        params.append((w1, b1, w2, b2, wd, bd))
    return params


# ---------------- pure-JAX reference (mirrors the kernel's numerics) ------------
# All convs/dots run in f32 on bf16-rounded operands (exact products, f32 acc),
# which matches the MXU and avoids BF16xBF16=F32 ops unsupported on some backends.
def _r(a):
    return a.astype(jnp.bfloat16).astype(jnp.float32)


def _ref_block(x, params, K, d):
    w1, b1, w2, b2, wd, bd = params
    p = (K - 1) * d

    def conv(h, w, b):
        wt = jnp.transpose(w, (2, 1, 0))              # (Cout, Cin, K)
        y = jax.lax.conv_general_dilated(
            _r(h), _r(wt), window_strides=(1,), padding=[(p, p)],
            rhs_dilation=(d,), dimension_numbers=('NCH', 'OIH', 'NCH'),
            preferred_element_type=jnp.float32)
        if p > 0:
            y = y[:, :, :y.shape[2] - p]              # chomp
        return y + b[None, :, None]

    h1 = jax.nn.relu(conv(x, w1, b1))
    h2 = jax.nn.relu(conv(h1, w2, b2))
    if wd is None:
        res = x                                       # identity residual in f32
    else:
        res = jnp.einsum('ncl,co->nol', _r(x), _r(wd),
                         preferred_element_type=jnp.float32) + bd[None, :, None]
    return jax.nn.relu(h2 + res)


def _ref_tcn(x, params, K):
    h = x.astype(jnp.float32)
    for i, p in enumerate(params):
        h = _ref_block(h, p, K, 2 ** i)
    return h


if __name__ == "__main__":
    key = jax.random.PRNGKey(0)
    k_x, k_p = jax.random.split(key)

    # small shapes: batch=2, num_inputs=4, seq len=16, channels [8, 16, 16], K=3
    N, C_IN, L = 2, 4, 16
    NUM_CHANNELS = [8, 16, 16]        # last layer exercises the no-downsample path
    KERNEL_SIZE = 3

    x = jax.random.normal(k_x, (N, C_IN, L), jnp.float32)
    params = init_tcn_params(k_p, C_IN, NUM_CHANNELS, KERNEL_SIZE)

    out = jax.block_until_ready(temporal_conv_net(x, params, KERNEL_SIZE))
    ref = jax.block_until_ready(_ref_tcn(x, params, KERNEL_SIZE))

    assert out.shape == (N, NUM_CHANNELS[-1], L), out.shape
    max_err = float(jnp.max(jnp.abs(out - ref)))
    assert jnp.allclose(out, ref, atol=2e-4, rtol=2e-2), max_err

    print("KERNEL_OK")
</pallas_src>

<mosaic_0001>
module attributes {stable_mosaic.version = 11 : i64} {
  func.func @_tcn_fused_kernel(%arg0: i32, %arg1: memref<1x4x16xf32, #tpu.memory_space<vmem>>, %arg2: memref<12x8xbf16, #tpu.memory_space<vmem>>, %arg3: memref<1x8xf32, #tpu.memory_space<vmem>>, %arg4: memref<24x8xbf16, #tpu.memory_space<vmem>>, %arg5: memref<1x8xf32, #tpu.memory_space<vmem>>, %arg6: memref<4x8xbf16, #tpu.memory_space<vmem>>, %arg7: memref<1x8xf32, #tpu.memory_space<vmem>>, %arg8: memref<24x16xbf16, #tpu.memory_space<vmem>>, %arg9: memref<1x16xf32, #tpu.memory_space<vmem>>, %arg10: memref<48x16xbf16, #tpu.memory_space<vmem>>, %arg11: memref<1x16xf32, #tpu.memory_space<vmem>>, %arg12: memref<8x16xbf16, #tpu.memory_space<vmem>>, %arg13: memref<1x16xf32, #tpu.memory_space<vmem>>, %arg14: memref<48x16xbf16, #tpu.memory_space<vmem>>, %arg15: memref<1x16xf32, #tpu.memory_space<vmem>>, %arg16: memref<48x16xbf16, #tpu.memory_space<vmem>>, %arg17: memref<1x16xf32, #tpu.memory_space<vmem>>, %arg18: memref<1x16x16xf32, #tpu.memory_space<vmem>>, %arg19: memref<1x32x16xbf16, #tpu.memory_space<vmem>>) attributes {dimension_semantics = [#tpu.dimension_semantics<parallel>], iteration_bounds = array<i64: 2>, scalar_prefetch = 0 : i64, scratch_operands = 1 : i64, tpu.core_type = #tpu.core_type<tc>, window_params = [{transform_indices = @transform_0, window_bounds = array<i64: 1, 4, 16>}, {pipeline_mode = #tpu.pipeline_mode<synchronous>, transform_indices = @transform_1, window_bounds = array<i64: 12, 8>}, {pipeline_mode = #tpu.pipeline_mode<synchronous>, transform_indices = @transform_2, window_bounds = array<i64: 1, 8>}, {pipeline_mode = #tpu.pipeline_mode<synchronous>, transform_indices = @transform_3, window_bounds = array<i64: 24, 8>}, {pipeline_mode = #tpu.pipeline_mode<synchronous>, transform_indices = @transform_4, window_bounds = array<i64: 1, 8>}, {pipeline_mode = #tpu.pipeline_mode<synchronous>, transform_indices = @transform_5, window_bounds = array<i64: 4, 8>}, {pipeline_mode = #tpu.pipeline_mode<synchronous>, transform_indices = @transform_6, window_bounds = array<i64: 1, 8>}, {pipeline_mode = #tpu.pipeline_mode<synchronous>, transform_indices = @transform_7, window_bounds = array<i64: 24, 16>}, {pipeline_mode = #tpu.pipeline_mode<synchronous>, transform_indices = @transform_8, window_bounds = array<i64: 1, 16>}, {pipeline_mode = #tpu.pipeline_mode<synchronous>, transform_indices = @transform_9, window_bounds = array<i64: 48, 16>}, {pipeline_mode = #tpu.pipeline_mode<synchronous>, transform_indices = @transform_10, window_bounds = array<i64: 1, 16>}, {pipeline_mode = #tpu.pipeline_mode<synchronous>, transform_indices = @transform_11, window_bounds = array<i64: 8, 16>}, {pipeline_mode = #tpu.pipeline_mode<synchronous>, transform_indices = @transform_12, window_bounds = array<i64: 1, 16>}, {pipeline_mode = #tpu.pipeline_mode<synchronous>, transform_indices = @transform_13, window_bounds = array<i64: 48, 16>}, {pipeline_mode = #tpu.pipeline_mode<synchronous>, transform_indices = @transform_14, window_bounds = array<i64: 1, 16>}, {pipeline_mode = #tpu.pipeline_mode<synchronous>, transform_indices = @transform_15, window_bounds = array<i64: 48, 16>}, {pipeline_mode = #tpu.pipeline_mode<synchronous>, transform_indices = @transform_16, window_bounds = array<i64: 1, 16>}, {transform_indices = @transform_17, window_bounds = array<i64: 1, 16, 16>}]} {
    %cst = arith.constant 0.000000e+00 : bf16
    %0 = vector.broadcast %cst : bf16 to vector<1x16x16xbf16>
    %c0 = arith.constant 0 : index
    %c0_0 = arith.constant 0 : index
    %c0_1 = arith.constant 0 : index
    %1 = vector.load %arg19[%c0, %c0_0, %c0_1] : memref<1x32x16xbf16, #tpu.memory_space<vmem>>, vector<1x16x16xbf16>
    tpu.vector_store %arg19[%c0, %c0_0, %c0_1], %0 {strides = array<i32>} : memref<1x32x16xbf16, #tpu.memory_space<vmem>>, vector<1x16x16xbf16>,
    %c0_2 = arith.constant 0 : index
    %c0_3 = arith.constant 0 : index
    %c0_4 = arith.constant 0 : index
    %2 = vector.load %arg1[%c0_2, %c0_3, %c0_4] : memref<1x4x16xf32, #tpu.memory_space<vmem>>, vector<1x4x16xf32>
    %3 = tpu.transpose %2, [0, 2, 1] : vector<1x4x16xf32> -> vector<1x16x4xf32>
    %4 = arith.truncf %3 : vector<1x16x4xf32> to vector<1x16x4xbf16>
    %c0_5 = arith.constant 0 : index
    %c16 = arith.constant 16 : index
    %c0_6 = arith.constant 0 : index
    %5 = vector.load %arg19[%c0_5, %c16, %c0_6] : memref<1x32x16xbf16, #tpu.memory_space<vmem>>, vector<1x16x4xbf16>
    tpu.vector_store %arg19[%c0_5, %c16, %c0_6], %4 {strides = array<i32>} : memref<1x32x16xbf16, #tpu.memory_space<vmem>>, vector<1x16x4xbf16>,
    %c0_7 = arith.constant 0 : index
    %c14 = arith.constant 14 : index
    %c0_8 = arith.constant 0 : index
    %6 = vector.load %arg19[%c0_7, %c14, %c0_8] : memref<1x32x16xbf16, #tpu.memory_space<vmem>>, vector<1x16x4xbf16>
    %c0_9 = arith.constant 0 : index
    %c15 = arith.constant 15 : index
    %c0_10 = arith.constant 0 : index
    %7 = vector.load %arg19[%c0_9, %c15, %c0_10] : memref<1x32x16xbf16, #tpu.memory_space<vmem>>, vector<1x16x4xbf16>
    %c0_11 = arith.constant 0 : index
    %c16_12 = arith.constant 16 : index
    %c0_13 = arith.constant 0 : index
    %8 = vector.load %arg19[%c0_11, %c16_12, %c0_13] : memref<1x32x16xbf16, #tpu.memory_space<vmem>>, vector<1x16x4xbf16>
    %9 = tpu.concatenate %6, %7, %8 in 2 : vector<1x16x4xbf16>, vector<1x16x4xbf16>, vector<1x16x4xbf16> -> vector<1x16x12xbf16>
    %10 = vector.shape_cast %9 : vector<1x16x12xbf16> to vector<16x12xbf16>
    %c0_14 = arith.constant 0 : index
    %c0_15 = arith.constant 0 : index
    %11 = vector.load %arg2[%c0_14, %c0_15] : memref<12x8xbf16, #tpu.memory_space<vmem>>, vector<12x8xbf16>
    %cst_16 = arith.constant dense<0.000000e+00> : vector<16x8xf32>
    %12 = tpu.matmul %10, %11, %cst_16 {dimension_numbers = #tpu.dot_dimension_numbers<[1], [0], [0], [1], [0, 0, 1, 1], [], []>} : vector<16x12xbf16>, vector<12x8xbf16>, vector<16x8xf32> -> vector<16x8xf32>
    %c0_17 = arith.constant 0 : index
    %c0_18 = arith.constant 0 : index
    %13 = vector.load %arg3[%c0_17, %c0_18] : memref<1x8xf32, #tpu.memory_space<vmem>>, vector<1x8xf32>
    %14 = vector.broadcast %13 : vector<1x8xf32> to vector<16x8xf32>
    %15 = arith.addf %12, %14 : vector<16x8xf32>
    %cst_19 = arith.constant 0.000000e+00 : f32
    %16 = vector.broadcast %cst_19 : f32 to vector<16x8xf32>
    %17 = arith.maximumf %15, %16 : vector<16x8xf32>
    %c0_20 = arith.constant 0 : index
    %c16_21 = arith.constant 16 : index
    %c0_22 = arith.constant 0 : index
    %18 = vector.load %arg19[%c0_20, %c16_21, %c0_22] : memref<1x32x16xbf16, #tpu.memory_space<vmem>>, vector<1x16x4xbf16>
    %19 = vector.shape_cast %18 : vector<1x16x4xbf16> to vector<16x4xbf16>
    %c0_23 = arith.constant 0 : index
    %c0_24 = arith.constant 0 : index
    %20 = vector.load %arg6[%c0_23, %c0_24] : memref<4x8xbf16, #tpu.memory_space<vmem>>, vector<4x8xbf16>
    %cst_25 = arith.constant dense<0.000000e+00> : vector<16x8xf32>
    %21 = tpu.matmul %19, %20, %cst_25 {dimension_numbers = #tpu.dot_dimension_numbers<[1], [0], [0], [1], [0, 0, 1, 1], [], []>} : vector<16x4xbf16>, vector<4x8xbf16>, vector<16x8xf32> -> vector<16x8xf32>
    %c0_26 = arith.constant 0 : index
    %c0_27 = arith.constant 0 : index
    %22 = vector.load %arg7[%c0_26, %c0_27] : memref<1x8xf32, #tpu.memory_space<vmem>>, vector<1x8xf32>
    %23 = vector.broadcast %22 : vector<1x8xf32> to vector<16x8xf32>
    %24 = arith.addf %21, %23 : vector<16x8xf32>
    %25 = vector.shape_cast %17 : vector<16x8xf32> to vector<1x16x8xf32>
    %26 = arith.truncf %25 : vector<1x16x8xf32> to vector<1x16x8xbf16>
    %c0_28 = arith.constant 0 : index
    %c16_29 = arith.constant 16 : index
    %c0_30 = arith.constant 0 : index
    %27 = vector.load %arg19[%c0_28, %c16_29, %c0_30] : memref<1x32x16xbf16, #tpu.memory_space<vmem>>, vector<1x16x8xbf16>
    tpu.vector_store %arg19[%c0_28, %c16_29, %c0_30], %26 {strides = array<i32>} : memref<1x32x16xbf16, #tpu.memory_space<vmem>>, vector<1x16x8xbf16>,
    %c0_31 = arith.constant 0 : index
    %c14_32 = arith.constant 14 : index
    %c0_33 = arith.constant 0 : index
    %28 = vector.load %arg19[%c0_31, %c14_32, %c0_33] : memref<1x32x16xbf16, #tpu.memory_space<vmem>>, vector<1x16x8xbf16>
    %c0_34 = arith.constant 0 : index
    %c15_35 = arith.constant 15 : index
    %c0_36 = arith.constant 0 : index
    %29 = vector.load %arg19[%c0_34, %c15_35, %c0_36] : memref<1x32x16xbf16, #tpu.memory_space<vmem>>, vector<1x16x8xbf16>
    %c0_37 = arith.constant 0 : index
    %c16_38 = arith.constant 16 : index
    %c0_39 = arith.constant 0 : index
    %30 = vector.load %arg19[%c0_37, %c16_38, %c0_39] : memref<1x32x16xbf16, #tpu.memory_space<vmem>>, vector<1x16x8xbf16>
    %31 = tpu.concatenate %28, %29, %30 in 2 : vector<1x16x8xbf16>, vector<1x16x8xbf16>, vector<1x16x8xbf16> -> vector<1x16x24xbf16>
    %32 = vector.shape_cast %31 : vector<1x16x24xbf16> to vector<16x24xbf16>
    %c0_40 = arith.constant 0 : index
    %c0_41 = arith.constant 0 : index
    %33 = vector.load %arg4[%c0_40, %c0_41] : memref<24x8xbf16, #tpu.memory_space<vmem>>, vector<24x8xbf16>
    %cst_42 = arith.constant dense<0.000000e+00> : vector<16x8xf32>
    %34 = tpu.matmul %32, %33, %cst_42 {dimension_numbers = #tpu.dot_dimension_numbers<[1], [0], [0], [1], [0, 0, 1, 1], [], []>} : vector<16x24xbf16>, vector<24x8xbf16>, vector<16x8xf32> -> vector<16x8xf32>
    %c0_43 = arith.constant 0 : index
    %c0_44 = arith.constant 0 : index
    %35 = vector.load %arg5[%c0_43, %c0_44] : memref<1x8xf32, #tpu.memory_space<vmem>>, vector<1x8xf32>
    %36 = vector.broadcast %35 : vector<1x8xf32> to vector<16x8xf32>
    %37 = arith.addf %34, %36 : vector<16x8xf32>
    %cst_45 = arith.constant 0.000000e+00 : f32
    %38 = vector.broadcast %cst_45 : f32 to vector<16x8xf32>
    %39 = arith.maximumf %37, %38 : vector<16x8xf32>
    %40 = arith.addf %39, %24 : vector<16x8xf32>
    %cst_46 = arith.constant 0.000000e+00 : f32
    %41 = vector.broadcast %cst_46 : f32 to vector<16x8xf32>
    %42 = arith.maximumf %40, %41 : vector<16x8xf32>
    %43 = vector.shape_cast %42 : vector<16x8xf32> to vector<1x16x8xf32>
    %44 = arith.truncf %43 : vector<1x16x8xf32> to vector<1x16x8xbf16>
    %c0_47 = arith.constant 0 : index
    %c16_48 = arith.constant 16 : index
    %c0_49 = arith.constant 0 : index
    %45 = vector.load %arg19[%c0_47, %c16_48, %c0_49] : memref<1x32x16xbf16, #tpu.memory_space<vmem>>, vector<1x16x8xbf16>
    tpu.vector_store %arg19[%c0_47, %c16_48, %c0_49], %44 {strides = array<i32>} : memref<1x32x16xbf16, #tpu.memory_space<vmem>>, vector<1x16x8xbf16>,
    %c0_50 = arith.constant 0 : index
    %c12 = arith.constant 12 : index
    %c0_51 = arith.constant 0 : index
    %46 = vector.load %arg19[%c0_50, %c12, %c0_51] : memref<1x32x16xbf16, #tpu.memory_space<vmem>>, vector<1x16x8xbf16>
    %c0_52 = arith.constant 0 : index
    %c14_53 = arith.constant 14 : index
    %c0_54 = arith.constant 0 : index
    %47 = vector.load %arg19[%c0_52, %c14_53, %c0_54] : memref<1x32x16xbf16, #tpu.memory_space<vmem>>, vector<1x16x8xbf16>
    %c0_55 = arith.constant 0 : index
    %c16_56 = arith.constant 16 : index
    %c0_57 = arith.constant 0 : index
    %48 = vector.load %arg19[%c0_55, %c16_56, %c0_57] : memref<1x32x16xbf16, #tpu.memory_space<vmem>>, vector<1x16x8xbf16>
    %49 = tpu.concatenate %46, %47, %48 in 2 : vector<1x16x8xbf16>, vector<1x16x8xbf16>, vector<1x16x8xbf16> -> vector<1x16x24xbf16>
    %50 = vector.shape_cast %49 : vector<1x16x24xbf16> to vector<16x24xbf16>
    %c0_58 = arith.constant 0 : index
    %c0_59 = arith.constant 0 : index
    %51 = vector.load %arg8[%c0_58, %c0_59] : memref<24x16xbf16, #tpu.memory_space<vmem>>, vector<24x16xbf16>
    %cst_60 = arith.constant dense<0.000000e+00> : vector<16x16xf32>
    %52 = tpu.matmul %50, %51, %cst_60 {dimension_numbers = #tpu.dot_dimension_numbers<[1], [0], [0], [1], [0, 0, 1, 1], [], []>} : vector<16x24xbf16>, vector<24x16xbf16>, vector<16x16xf32> -> vector<16x16xf32>
    %c0_61 = arith.constant 0 : index
    %c0_62 = arith.constant 0 : index
    %53 = vector.load %arg9[%c0_61, %c0_62] : memref<1x16xf32, #tpu.memory_space<vmem>>, vector<1x16xf32>
    %54 = vector.broadcast %53 : vector<1x16xf32> to vector<16x16xf32>
    %55 = arith.addf %52, %54 : vector<16x16xf32>
    %cst_63 = arith.constant 0.000000e+00 : f32
    %56 = vector.broadcast %cst_63 : f32 to vector<16x16xf32>
    %57 = arith.maximumf %55, %56 : vector<16x16xf32>
    %c0_64 = arith.constant 0 : index
    %c16_65 = arith.constant 16 : index
    %c0_66 = arith.constant 0 : index
    %58 = vector.load %arg19[%c0_64, %c16_65, %c0_66] : memref<1x32x16xbf16, #tpu.memory_space<vmem>>, vector<1x16x8xbf16>
    %59 = vector.shape_cast %58 : vector<1x16x8xbf16> to vector<16x8xbf16>
    %c0_67 = arith.constant 0 : index
    %c0_68 = arith.constant 0 : index
    %60 = vector.load %arg12[%c0_67, %c0_68] : memref<8x16xbf16, #tpu.memory_space<vmem>>, vector<8x16xbf16>
    %cst_69 = arith.constant dense<0.000000e+00> : vector<16x16xf32>
    %61 = tpu.matmul %59, %60, %cst_69 {dimension_numbers = #tpu.dot_dimension_numbers<[1], [0], [0], [1], [0, 0, 1, 1], [], []>} : vector<16x8xbf16>, vector<8x16xbf16>, vector<16x16xf32> -> vector<16x16xf32>
    %c0_70 = arith.constant 0 : index
    %c0_71 = arith.constant 0 : index
    %62 = vector.load %arg13[%c0_70, %c0_71] : memref<1x16xf32, #tpu.memory_space<vmem>>, vector<1x16xf32>
    %63 = vector.broadcast %62 : vector<1x16xf32> to vector<16x16xf32>
    %64 = arith.addf %61, %63 : vector<16x16xf32>
    %65 = vector.shape_cast %57 : vector<16x16xf32> to vector<1x16x16xf32>
    %66 = arith.truncf %65 : vector<1x16x16xf32> to vector<1x16x16xbf16>
    %c0_72 = arith.constant 0 : index
    %c16_73 = arith.constant 16 : index
    %c0_74 = arith.constant 0 : index
    %67 = vector.load %arg19[%c0_72, %c16_73, %c0_74] : memref<1x32x16xbf16, #tpu.memory_space<vmem>>, vector<1x16x16xbf16>
    tpu.vector_store %arg19[%c0_72, %c16_73, %c0_74], %66 {strides = array<i32>} : memref<1x32x16xbf16, #tpu.memory_space<vmem>>, vector<1x16x16xbf16>,
    %c0_75 = arith.constant 0 : index
    %c12_76 = arith.constant 12 : index
    %c0_77 = arith.constant 0 : index
    %68 = vector.load %arg19[%c0_75, %c12_76, %c0_77] : memref<1x32x16xbf16, #tpu.memory_space<vmem>>, vector<1x16x16xbf16>
    %c0_78 = arith.constant 0 : index
    %c14_79 = arith.constant 14 : index
    %c0_80 = arith.constant 0 : index
    %69 = vector.load %arg19[%c0_78, %c14_79, %c0_80] : memref<1x32x16xbf16, #tpu.memory_space<vmem>>, vector<1x16x16xbf16>
    %c0_81 = arith.constant 0 : index
    %c16_82 = arith.constant 16 : index
    %c0_83 = arith.constant 0 : index
    %70 = vector.load %arg19[%c0_81, %c16_82, %c0_83] : memref<1x32x16xbf16, #tpu.memory_space<vmem>>, vector<1x16x16xbf16>
    %71 = tpu.concatenate %68, %69, %70 in 2 : vector<1x16x16xbf16>, vector<1x16x16xbf16>, vector<1x16x16xbf16> -> vector<1x16x48xbf16>
    %72 = vector.shape_cast %71 : vector<1x16x48xbf16> to vector<16x48xbf16>
    %c0_84 = arith.constant 0 : index
    %c0_85 = arith.constant 0 : index
    %73 = vector.load %arg10[%c0_84, %c0_85] : memref<48x16xbf16, #tpu.memory_space<vmem>>, vector<48x16xbf16>
    %cst_86 = arith.constant dense<0.000000e+00> : vector<16x16xf32>
    %74 = tpu.matmul %72, %73, %cst_86 {dimension_numbers = #tpu.dot_dimension_numbers<[1], [0], [0], [1], [0, 0, 1, 1], [], []>} : vector<16x48xbf16>, vector<48x16xbf16>, vector<16x16xf32> -> vector<16x16xf32>
    %c0_87 = arith.constant 0 : index
    %c0_88 = arith.constant 0 : index
    %75 = vector.load %arg11[%c0_87, %c0_88] : memref<1x16xf32, #tpu.memory_space<vmem>>, vector<1x16xf32>
    %76 = vector.broadcast %75 : vector<1x16xf32> to vector<16x16xf32>
    %77 = arith.addf %74, %76 : vector<16x16xf32>
    %cst_89 = arith.constant 0.000000e+00 : f32
    %78 = vector.broadcast %cst_89 : f32 to vector<16x16xf32>
    %79 = arith.maximumf %77, %78 : vector<16x16xf32>
    %80 = arith.addf %79, %64 : vector<16x16xf32>
    %cst_90 = arith.constant 0.000000e+00 : f32
    %81 = vector.broadcast %cst_90 : f32 to vector<16x16xf32>
    %82 = arith.maximumf %80, %81 : vector<16x16xf32>
    %83 = vector.shape_cast %82 : vector<16x16xf32> to vector<1x16x16xf32>
    %84 = arith.truncf %83 : vector<1x16x16xf32> to vector<1x16x16xbf16>
    %c0_91 = arith.constant 0 : index
    %c16_92 = arith.constant 16 : index
    %c0_93 = arith.constant 0 : index
    %85 = vector.load %arg19[%c0_91, %c16_92, %c0_93] : memref<1x32x16xbf16, #tpu.memory_space<vmem>>, vector<1x16x16xbf16>
    tpu.vector_store %arg19[%c0_91, %c16_92, %c0_93], %84 {strides = array<i32>} : memref<1x32x16xbf16, #tpu.memory_space<vmem>>, vector<1x16x16xbf16>,
    %c0_94 = arith.constant 0 : index
    %c8 = arith.constant 8 : index
    %c0_95 = arith.constant 0 : index
    %86 = vector.load %arg19[%c0_94, %c8, %c0_95] : memref<1x32x16xbf16, #tpu.memory_space<vmem>>, vector<1x16x16xbf16>
    %c0_96 = arith.constant 0 : index
    %c12_97 = arith.constant 12 : index
    %c0_98 = arith.constant 0 : index
    %87 = vector.load %arg19[%c0_96, %c12_97, %c0_98] : memref<1x32x16xbf16, #tpu.memory_space<vmem>>, vector<1x16x16xbf16>
    %c0_99 = arith.constant 0 : index
    %c16_100 = arith.constant 16 : index
    %c0_101 = arith.constant 0 : index
    %88 = vector.load %arg19[%c0_99, %c16_100, %c0_101] : memref<1x32x16xbf16, #tpu.memory_space<vmem>>, vector<1x16x16xbf16>
    %89 = tpu.concatenate %86, %87, %88 in 2 : vector<1x16x16xbf16>, vector<1x16x16xbf16>, vector<1x16x16xbf16> -> vector<1x16x48xbf16>
    %90 = vector.shape_cast %89 : vector<1x16x48xbf16> to vector<16x48xbf16>
    %c0_102 = arith.constant 0 : index
    %c0_103 = arith.constant 0 : index
    %91 = vector.load %arg14[%c0_102, %c0_103] : memref<48x16xbf16, #tpu.memory_space<vmem>>, vector<48x16xbf16>
    %cst_104 = arith.constant dense<0.000000e+00> : vector<16x16xf32>
    %92 = tpu.matmul %90, %91, %cst_104 {dimension_numbers = #tpu.dot_dimension_numbers<[1], [0], [0], [1], [0, 0, 1, 1], [], []>} : vector<16x48xbf16>, vector<48x16xbf16>, vector<16x16xf32> -> vector<16x16xf32>
    %c0_105 = arith.constant 0 : index
    %c0_106 = arith.constant 0 : index
    %93 = vector.load %arg15[%c0_105, %c0_106] : memref<1x16xf32, #tpu.memory_space<vmem>>, vector<1x16xf32>
    %94 = vector.broadcast %93 : vector<1x16xf32> to vector<16x16xf32>
    %95 = arith.addf %92, %94 : vector<16x16xf32>
    %cst_107 = arith.constant 0.000000e+00 : f32
    %96 = vector.broadcast %cst_107 : f32 to vector<16x16xf32>
    %97 = arith.maximumf %95, %96 : vector<16x16xf32>
    %98 = vector.shape_cast %83 : vector<1x16x16xf32> to vector<16x16xf32>
    %99 = vector.shape_cast %97 : vector<16x16xf32> to vector<1x16x16xf32>
    %100 = arith.truncf %99 : vector<1x16x16xf32> to vector<1x16x16xbf16>
    %c0_108 = arith.constant 0 : index
    %c16_109 = arith.constant 16 : index
    %c0_110 = arith.constant 0 : index
    %101 = vector.load %arg19[%c0_108, %c16_109, %c0_110] : memref<1x32x16xbf16, #tpu.memory_space<vmem>>, vector<1x16x16xbf16>
    tpu.vector_store %arg19[%c0_108, %c16_109, %c0_110], %100 {strides = array<i32>} : memref<1x32x16xbf16, #tpu.memory_space<vmem>>, vector<1x16x16xbf16>,
    %c0_111 = arith.constant 0 : index
    %c8_112 = arith.constant 8 : index
    %c0_113 = arith.constant 0 : index
    %102 = vector.load %arg19[%c0_111, %c8_112, %c0_113] : memref<1x32x16xbf16, #tpu.memory_space<vmem>>, vector<1x16x16xbf16>
    %c0_114 = arith.constant 0 : index
    %c12_115 = arith.constant 12 : index
    %c0_116 = arith.constant 0 : index
    %103 = vector.load %arg19[%c0_114, %c12_115, %c0_116] : memref<1x32x16xbf16, #tpu.memory_space<vmem>>, vector<1x16x16xbf16>
    %c0_117 = arith.constant 0 : index
    %c16_118 = arith.constant 16 : index
    %c0_119 = arith.constant 0 : index
    %104 = vector.load %arg19[%c0_117, %c16_118, %c0_119] : memref<1x32x16xbf16, #tpu.memory_space<vmem>>, vector<1x16x16xbf16>
    %105 = tpu.concatenate %102, %103, %104 in 2 : vector<1x16x16xbf16>, vector<1x16x16xbf16>, vector<1x16x16xbf16> -> vector<1x16x48xbf16>
    %106 = vector.shape_cast %105 : vector<1x16x48xbf16> to vector<16x48xbf16>
    %c0_120 = arith.constant 0 : index
    %c0_121 = arith.constant 0 : index
    %107 = vector.load %arg16[%c0_120, %c0_121] : memref<48x16xbf16, #tpu.memory_space<vmem>>, vector<48x16xbf16>
    %cst_122 = arith.constant dense<0.000000e+00> : vector<16x16xf32>
    %108 = tpu.matmul %106, %107, %cst_122 {dimension_numbers = #tpu.dot_dimension_numbers<[1], [0], [0], [1], [0, 0, 1, 1], [], []>} : vector<16x48xbf16>, vector<48x16xbf16>, vector<16x16xf32> -> vector<16x16xf32>
    %c0_123 = arith.constant 0 : index
    %c0_124 = arith.constant 0 : index
    %109 = vector.load %arg17[%c0_123, %c0_124] : memref<1x16xf32, #tpu.memory_space<vmem>>, vector<1x16xf32>
    %110 = vector.broadcast %109 : vector<1x16xf32> to vector<16x16xf32>
    %111 = arith.addf %108, %110 : vector<16x16xf32>
    %cst_125 = arith.constant 0.000000e+00 : f32
    %112 = vector.broadcast %cst_125 : f32 to vector<16x16xf32>
    %113 = arith.maximumf %111, %112 : vector<16x16xf32>
    %114 = arith.addf %113, %98 : vector<16x16xf32>
    %cst_126 = arith.constant 0.000000e+00 : f32
    %115 = vector.broadcast %cst_126 : f32 to vector<16x16xf32>
    %116 = arith.maximumf %114, %115 : vector<16x16xf32>
    %117 = vector.shape_cast %116 : vector<16x16xf32> to vector<1x16x16xf32>
    %118 = tpu.transpose %117, [0, 2, 1] : vector<1x16x16xf32> -> vector<1x16x16xf32>
    %c0_127 = arith.constant 0 : index
    %c0_128 = arith.constant 0 : index
    %c0_129 = arith.constant 0 : index
    %119 = vector.load %arg18[%c0_127, %c0_128, %c0_129] : memref<1x16x16xf32, #tpu.memory_space<vmem>>, vector<1x16x16xf32>
    tpu.vector_store %arg18[%c0_127, %c0_128, %c0_129], %118 {strides = array<i32>} : memref<1x16x16xf32, #tpu.memory_space<vmem>>, vector<1x16x16xf32>,
    return
  }
  func.func @transform_0(%arg0: i32) -> (i32, i32, i32) {
    %c0_i32 = arith.constant 0 : i32
    %c0_i32_0 = arith.constant 0 : i32
    %c0_i32_1 = arith.constant 0 : i32
    return %arg0, %c0_i32, %c0_i32_0 : i32, i32, i32
  }
  func.func @transform_1(%arg0: i32) -> (i32, i32) {
    %c0_i32 = arith.constant 0 : i32
    %c0_i32_0 = arith.constant 0 : i32
    %c0_i32_1 = arith.constant 0 : i32
    return %c0_i32, %c0_i32_0 : i32, i32
  }
  func.func @transform_2(%arg0: i32) -> (i32, i32) {
    %c0_i32 = arith.constant 0 : i32
    %c0_i32_0 = arith.constant 0 : i32
    %c0_i32_1 = arith.constant 0 : i32
    return %c0_i32, %c0_i32_0 : i32, i32
  }
  func.func @transform_3(%arg0: i32) -> (i32, i32) {
    %c0_i32 = arith.constant 0 : i32
    %c0_i32_0 = arith.constant 0 : i32
    %c0_i32_1 = arith.constant 0 : i32
    return %c0_i32, %c0_i32_0 : i32, i32
  }
  func.func @transform_4(%arg0: i32) -> (i32, i32) {
    %c0_i32 = arith.constant 0 : i32
    %c0_i32_0 = arith.constant 0 : i32
    %c0_i32_1 = arith.constant 0 : i32
    return %c0_i32, %c0_i32_0 : i32, i32
  }
  func.func @transform_5(%arg0: i32) -> (i32, i32) {
    %c0_i32 = arith.constant 0 : i32
    %c0_i32_0 = arith.constant 0 : i32
    %c0_i32_1 = arith.constant 0 : i32
    return %c0_i32, %c0_i32_0 : i32, i32
  }
  func.func @transform_6(%arg0: i32) -> (i32, i32) {
    %c0_i32 = arith.constant 0 : i32
    %c0_i32_0 = arith.constant 0 : i32
    %c0_i32_1 = arith.constant 0 : i32
    return %c0_i32, %c0_i32_0 : i32, i32
  }
  func.func @transform_7(%arg0: i32) -> (i32, i32) {
    %c0_i32 = arith.constant 0 : i32
    %c0_i32_0 = arith.constant 0 : i32
    %c0_i32_1 = arith.constant 0 : i32
    return %c0_i32, %c0_i32_0 : i32, i32
  }
  func.func @transform_8(%arg0: i32) -> (i32, i32) {
    %c0_i32 = arith.constant 0 : i32
    %c0_i32_0 = arith.constant 0 : i32
    %c0_i32_1 = arith.constant 0 : i32
    return %c0_i32, %c0_i32_0 : i32, i32
  }
  func.func @transform_9(%arg0: i32) -> (i32, i32) {
    %c0_i32 = arith.constant 0 : i32
    %c0_i32_0 = arith.constant 0 : i32
    %c0_i32_1 = arith.constant 0 : i32
    return %c0_i32, %c0_i32_0 : i32, i32
  }
  func.func @transform_10(%arg0: i32) -> (i32, i32) {
    %c0_i32 = arith.constant 0 : i32
    %c0_i32_0 = arith.constant 0 : i32
    %c0_i32_1 = arith.constant 0 : i32
    return %c0_i32, %c0_i32_0 : i32, i32
  }
  func.func @transform_11(%arg0: i32) -> (i32, i32) {
    %c0_i32 = arith.constant 0 : i32
    %c0_i32_0 = arith.constant 0 : i32
    %c0_i32_1 = arith.constant 0 : i32
    return %c0_i32, %c0_i32_0 : i32, i32
  }
  func.func @transform_12(%arg0: i32) -> (i32, i32) {
    %c0_i32 = arith.constant 0 : i32
    %c0_i32_0 = arith.constant 0 : i32
    %c0_i32_1 = arith.constant 0 : i32
    return %c0_i32, %c0_i32_0 : i32, i32
  }
  func.func @transform_13(%arg0: i32) -> (i32, i32) {
    %c0_i32 = arith.constant 0 : i32
    %c0_i32_0 = arith.constant 0 : i32
    %c0_i32_1 = arith.constant 0 : i32
    return %c0_i32, %c0_i32_0 : i32, i32
  }
  func.func @transform_14(%arg0: i32) -> (i32, i32) {
    %c0_i32 = arith.constant 0 : i32
    %c0_i32_0 = arith.constant 0 : i32
    %c0_i32_1 = arith.constant 0 : i32
    return %c0_i32, %c0_i32_0 : i32, i32
  }
  func.func @transform_15(%arg0: i32) -> (i32, i32) {
    %c0_i32 = arith.constant 0 : i32
    %c0_i32_0 = arith.constant 0 : i32
    %c0_i32_1 = arith.constant 0 : i32
    return %c0_i32, %c0_i32_0 : i32, i32
  }
  func.func @transform_16(%arg0: i32) -> (i32, i32) {
    %c0_i32 = arith.constant 0 : i32
    %c0_i32_0 = arith.constant 0 : i32
    %c0_i32_1 = arith.constant 0 : i32
    return %c0_i32, %c0_i32_0 : i32, i32
  }
  func.func @transform_17(%arg0: i32) -> (i32, i32, i32) {
    %c0_i32 = arith.constant 0 : i32
    %c0_i32_0 = arith.constant 0 : i32
    %c0_i32_1 = arith.constant 0 : i32
    return %arg0, %c0_i32, %c0_i32_0 : i32, i32, i32
  }
}

</mosaic_0001>

<bundles_post_ra>
// kernel: tpu_custom_call.1
= control target key start
LH: loop header
LB: loop body
LE: loop exit
PB: predicated region body
PF: predicated region fallthrough
CT: control target
= control target key end

     0   :  { %s2115_s0 = inlined_call_operand.vmem [shape: f32[2,4,16], index: 0, kind: input, shape index: {}]   ;;  %s2116_s1 = inlined_call_operand.vmem [shape: bf16[12,8], index: 1, kind: input, shape index: {}]   ;;  %s2117_s2 = inlined_call_operand.vmem [shape: f32[1,8], index: 2, kind: input, shape index: {}]   ;;  %s2118_s3 = inlined_call_operand.vmem [shape: bf16[24,8], index: 3, kind: input, shape index: {}]   ;;  %s2119_s4 = inlined_call_operand.vmem [shape: f32[1,8], index: 4, kind: input, shape index: {}]   ;;  %s2120_s5 = inlined_call_operand.vmem [shape: bf16[4,8], index: 5, kind: input, shape index: {}]   ;;  %s2121_s6 = inlined_call_operand.vmem [shape: f32[1,8], index: 6, kind: input, shape index: {}]   ;;  %s2122_s7 = inlined_call_operand.vmem [shape: bf16[24,16], index: 7, kind: input, shape index: {}]   ;;  %s2123_s8 = inlined_call_operand.vmem [shape: f32[1,16], index: 8, kind: input, shape index: {}]   ;;  %s2124_s9 = inlined_call_operand.vmem [shape: bf16[48,16], index: 9, kind: input, shape index: {}]   ;;  %s2125_s10 = inlined_call_operand.vmem [shape: f32[1,16], index: 10, kind: input, shape index: {}]   ;;  %s2126_s11 = inlined_call_operand.vmem [shape: bf16[8,16], index: 11, kind: input, shape index: {}]   ;;  %s2127_s12 = inlined_call_operand.vmem [shape: f32[1,16], index: 12, kind: input, shape index: {}]   ;;  %s2128_s13 = inlined_call_operand.vmem [shape: bf16[48,16], index: 13, kind: input, shape index: {}]   ;;  %s2129_s14 = inlined_call_operand.vmem [shape: f32[1,16], index: 14, kind: input, shape index: {}]   ;;  %s2130_s15 = inlined_call_operand.vmem [shape: bf16[48,16], index: 15, kind: input, shape index: {}]   ;;  %s2131_s16 = inlined_call_operand.vmem [shape: f32[1,16], index: 16, kind: input, shape index: {}]   ;;  %s2132_s17 = inlined_call_operand.hbm [shape: f32[2,16,16], index: 17, kind: output, shape index: {}]  }
   0x1   :  { %2135 = sst [smem:[#allocation8_spill]] %s2115_s0 }
   0x2   :  { %2136 = sst [smem:[#allocation9_spill]] %s2116_s1 }
   0x3   :  { %2137 = sst [smem:[#allocation10_spill]] %s2117_s2 }
   0x4   :  { %2138 = sst [smem:[#allocation11_spill]] %s2118_s3 }
   0x5   :  { %2139 = sst [smem:[#allocation12_spill]] %s2119_s4 }
   0x6   :  { %22 = vsyncpa [#allocation4], 0 }
   0x7   :  { %24 = vsyncpa [#allocation4 + $0x1], 0  ;;  %s1820_s24 = smov 0   ;;  %s1822_s25 = smov 0  }
   0x8   :  { %s1824_s26 = smov 0   ;;  %s1826_s27 = smov 0  }
   0x9 LB: > { %2140 = sst [smem:[#allocation6_spill]] %s1715_s26  ;;  %s1841_s28 = sadd.s32 4294967295, %s1719_s27   ;;  %s1719_s27 = sphi %s1826_s27, %s2154_s27   ;;  %s1715_s26 = sphi %s1824_s26, %s2151_s26   ;;  %s1711_s25 = sphi %s1822_s25, %s2153_s25   ;;  %s1707_s24 = sphi %s1820_s24, %s2152_s24  }
   0xa   : > { %s1466_s29 = sadd.s32 4294967294, %s1719_s27   ;;  %s1845_s0 = sadd.s32 1, %s1719_s27  }
   0xb   : > { %s399_s30 = sadd.s32 1, %s1715_s26  ;;  %s396_s18 = ssub.s32 %s1719_s27, %s1845_s0 }
   0xc   : > { %p409_p0 = scmp.ne.s32.totalorder %s1715_s26, %s1711_s25  ;;  %p397_p1 = scmp.eq.s32.totalorder %s396_s18, 0 }
   0xd   : > { %p410_p2 = scmp.eq.s32.totalorder %s1841_s28, 1  ;;  %p415_p3 = scmp.ne.s32.totalorder %s1711_s25, %s1707_s24 }
   0xe   : > { %p416_p4 = scmp.eq.s32.totalorder %s1466_s29, 1  ;;  %p1469_p7 = scmp.ge.s32.totalorder %s1719_s27, 1 }
   0xf   : > { %s1856_s19 = scalar_select %p397_p1, %s1715_s26, %s399_s30  }
  0x10   : > { %p1858_p5 = por %p410_p2, %p409_p0  ;;  %p1862_p6 = por %p416_p4, %p415_p3 }
  0x11   : > { %2141 = sst [smem:[#allocation7_spill]] %s1856_s19  ;;  %p489_p8 = scmp.lt.s32.totalorder %s1719_s27, 3 }
  0x13   : > { %p490_p9 = pnand %p1469_p7, %p489_p8 }
  0x14   : > { %p540_p10 = scmp.lt.s32.totalorder (!%p490_p9), %s1841_s28, 1  ;;  %s2144_s30 = sld [smem:[#allocation8_spill]] (!%p490_p9)  ;;  %v686_v1 = vld [vmem:[%s2120_s5] sm:$0x3] (!%p490_p9)  ;;  %vm696_vm0 = vcmask (!%p490_p9), 1041408   ;;  %v1721_v2 = vmov (!%p490_p9), 0.0  }
  0x15   : > { %493 = sbr.rel (%p490_p9) target bundleno = 2466 (0x9a2), region = 88  ;;  %1538 = vmatprep.subr.bf16.mxu1 (!%p490_p9), %v1721_v2  ;;  %v698_v3 = vsel (!%p490_p9), %vm696_vm0, %v686_v1, 0  ;;  %vm1722_vm1 = vmmov (!%p490_p9), 0   ;;  %vm545_vm2 = vcmask (!%p490_p9), 130048   ;;  %v1723_v4 = vmov (!%p490_p9), 0   ;;  %1532 = vmatprep.subr.bf16.mxu0 (!%p490_p9), %v1721_v2  ;;  %s2134_s23 = smov (!%p490_p9), 8  }
  0x16   : > { %1540 = vmatprep.mubr.msk.bf16.mxu1 (!%p490_p9), %vm1722_vm1, %v1721_v2  ;;  %1539 = vmatpush3.bf16.msra.mxu1 (!%p490_p9), %v698_v3  ;;  %546 = vst.msk [vmem:[#allocation2] sm:$0xff] (!%p490_p9), %vm545_vm2, %v1723_v4  ;;  %vm581_vm3 = vcmask (!%p490_p9), 31744   ;;  %vm639_vm4 = vcmask (!%p490_p9), 1045504   ;;  %vm586_vm5 = vsmask.f32 (!%p490_p9), 7424  ;;  %vm611_vm6 = vcmask (!%p490_p9), 64512  }
  0x17   : > { %1534 = vmatprep.mubr.msk.bf16.mxu0 (!%p490_p9), %vm1722_vm1, %v1721_v2  ;;  %1552 = vmatprep.subr.bf16.mxu1 (!%p490_p9), %v1721_v2  ;;  %vm626_vm7 = vcmask (!%p490_p9), 1040384   ;;  %vm635_vm8 = vcmask (!%p490_p9), 97280   ;;  %s2146_s2 = sld [smem:[#allocation10_spill]] (!%p490_p9)  ;;  %s2147_s3 = sld [smem:[#allocation11_spill]] (!%p490_p9)  ;;  %vm801_vm9 = vcmask (!%p490_p9), 1043456   ;;  %vm797_vm10 = vcmask (!%p490_p9), 195584  }
  0x18   : > { %v956_v4 = vld [vmem:[%s2126_s11] sm:$0xf] (!%p490_p9)  ;;  %s2148_s4 = sld [smem:[#allocation12_spill]] (!%p490_p9)  ;;  %vm861_vm11 = vcmask (!%p490_p9), 1046528   ;;  %s1727_s29 = smov (!%p490_p9), 32   ;;  %vm1037_vm12 = vcmask (!%p490_p9), 261120  }
  0x19   : > { %vm1077_vm13 = vcmask (!%p490_p9), 392192   ;;  %s1507_s19 = sshll.u32 (!%p490_p9), %s1841_s28, 8 }
  0x1c   : > { %s541_s21 = scalar_select %p540_p10, %s1841_s28, 1 }
  0x1d   : > { %v583_v9 = vld [vmem:[#allocation2] sm:$0x80]  ;;  %v1472_v34 = vld [vmem:[%s2146_s2] ss:$0 sm:$0xff]  ;;  %v1645_v46 = vld [vmem:[%s2147_s3 + $0x8] ss:$0 sps:$4 sm:$0xff]  }
  0x1e   : > { %s1471_s22 = sshll.u32 %s541_s21, 2  ;;  %s2145_s21 = sld [smem:[#allocation9_spill]]  ;;  %v588_v12 = vshrl.u32 %v583_v9, 16  ;;  %v1644_v44 = vld [vmem:[%s2147_s3] sm:$0xff]   ;;  %v803_v50 = vsel %vm801_vm9, %v1645_v46, 0 }
  0x1f   : > { %s543_s18 = scalar_lea.vmem %s2144_s30, %s1471_s22  ;;  %s1724_s22 = smov 4   ;;  %v743_v45 = vld [vmem:[#allocation2] sm:$0x80] }
  0x20   : > { %v547_v0 = vld [vmem:[%s543_s18] sm:$0xf]  ;;  %v747_v48 = vshrl.u32 %v743_v45, 16  ;;  %s1728_s28 = smov [#allocation3]  }
  0x21   : > { %548 = vxpose.xlu0.b32.start.end [1/1] (short) (narrow) %v547_v0, 16  ;;  %s1661_s3 = sshll.u32 %s1728_s28, 4  ;;  %s1662_s3 = int_to_ptr.vmem [resolvable:$false] %s1661_s3 }
  0x24   : > { %v1643_v8 = vld [vmem:[%s2145_s21] sm:$0x3f]  }
  0x25   : > { %v641_v10 = vsel %vm639_vm4, %v1643_v8, 0 }
  0x26   : > { %1533 = vmatpush3.bf16.msra.mxu0 %v641_v10 }
  0x27   : > { %1544 = vmatprep.subr.bf16.mxu0 %v1721_v2 }
  0xa1   : > { %v564_v5 = vpop.trf.xlu0 }
  0xa5   : > { %v565_v6 = vpop.trf.xlu0 }
  0xa6   : > { %v580_v7 = vpack.c.bf16 %v565_v6, %v564_v5  ;;  %v968_v5 = vsel %vm801_vm9, %v956_v4, 0  ;;  %v1477_v6 = vld [vmem:[%s2148_s4] ss:$0 sm:$0xff]  ;;  %s1663_s4 = scalar_lea.vmem %s1662_s3, 512 }
  0xa8   : > { %582 = vst.msk [vmem:[#allocation2 + $0x8] sm:$0xff] %vm581_vm3, %v580_v7  ;;  %v1475_v7 = vld [vmem:[%s2121_s6] ss:$0 sm:$0xff] }
  0xaf   : > { %v585_v11 = vld [vmem:[#allocation2 + $0x8] sm:$0xff] }
  0xb0   : > { %1541 = vmatmul.mubr.msk.bf16.vlgmr.msra.gmra.mrb[0].mxu1 %vm581_vm3, %v585_v11  ;;  %v591_v13 = vshll.u32 %v585_v11, 16  ;;  %v595_v15 = vshrl.u32 %v585_v11, 16  ;;  %v603_v18 = vrot.slane %v585_v11, 1  ;;  %v584_v21 = vld [vmem:[#allocation2 + $0x8] sm:$0x7f] }
  0xb1   : > { %1556 = vmatprep.mubr.msk.bf16.mxu1 %vm1722_vm1, %v1721_v2 }
  0xb2   : > { %v593_v14 = vrot.slane %v591_v13, 1 }
  0xb4   : > { %v594_v16 = vsel %vm586_vm5, %v588_v12, %v593_v14  ;;  %v597_v17 = vor.u32 %v595_v15, %v593_v14 }
  0xb5   : > { %598 = vrot.lane.b32.xlu0 %v594_v16, %s1724_s22 }
  0xb6   : > { %600 = vrot.lane.b32.xlu1 %v597_v17, %s1724_s22  ;;  %s1726_s22 = smov 16  }
  0xba   : > { %604 = vrot.lane.b32.xlu1 %v603_v18, %s2134_s23 }
 0x127   : > { %v599_v20 = vpop.permute.xlu0 %598 }
 0x128   : > { %v601_v19 = vpop.permute.xlu1 %600  ;;  %v607_v22 = vsel %vm581_vm3, %v583_v9, %v599_v20 }
 0x129   : > { %v610_v23 = vsel %vm581_vm3, %v584_v21, %v601_v19 }
 0x12c   : > { %v605_v24 = vpop.permute.xlu1 %604 }
 0x12d   : > { %v613_v25 = vsel %vm611_vm6, %v607_v22, %v605_v24  ;;  %v614_v26 = vsel %vm611_vm6, %v610_v23, %v605_v24  ;;  %v1646_v23 = vld [vmem:[%s2122_s7] sm:$0xff]   ;;  %v1647_v24 = vld [vmem:[%s2122_s7 + $0x8] ss:$0 sps:$4 sm:$0xff]  }
 0x12e   : > { %v627_v27 = vrot.slane %v613_v25, 7  ;;  %v628_v28 = vrot.slane %v614_v26, 7  ;;  %1553 = vmatpush3.bf16.msra.mxu1 %v1646_v23  ;;  %v911_v25 = vsel %vm801_vm9, %v1647_v24, 0  ;;  %v856_v26 = vld [vmem:[#allocation2] sm:$0x80] }
 0x12f   : > { %1554 = vmatprep.subr.bf16.mxu1 %v1721_v2 }
 0x130   : > { %v629_v29 = vsel %vm626_vm7, %v627_v27, %v628_v28 }
 0x131   : > { %1535 = vmatmul.mubr.msk.bf16.vlgmr.msra.gmra.mrb[0].mxu0 %vm635_vm8, %v629_v29 }
 0x132   : > { %1548 = vmatprep.mubr.msk.bf16.mxu0 %vm1722_vm1, %v1721_v2  ;;  %1545 = vmatpush3.bf16.msra.mxu0 %v1644_v44 }
 0x133   : > { %1546 = vmatprep.subr.bf16.mxu0 %v1721_v2  ;;  %1555 = vmatpush3.bf16.msra.mxu1 %v911_v25 }
 0x134   : > { %1566 = vmatprep.subr.bf16.mxu1 %v1721_v2 }
 0x136   : > { %1547 = vmatpush3.bf16.msra.mxu0 %v803_v50 }
 0x137   : > { %1560 = vmatprep.subr.bf16.mxu0 %v1721_v2 }
 0x183   : > { %v734_v30 = vpop.f32.mrb[0].mxu1 }
 0x184   : > { %v1542_v31 = vpop.f32.mrb[1].mxu1  ;;  %v735_v12 = vadd.f32 %v1475_v7, %v734_v30  ;;  %v862_v30 = vrot.slane %v856_v26, 1 }
 0x185   : > { %v737_v32 = vpop.f32.mrb[2].mxu1 }
 0x186   : > { %v1543_v33 = vpop.f32.mrb[3].mxu1  ;;  %v738_v16 = vadd.f32 %v1475_v7, %v737_v32 }
 0x204   : > { %v677_v35 = vpop.f32.mrb[0].mxu0 }
 0x205   : > { %v678_v36 = vadd.f32 %v1472_v34, %v677_v35  ;;  %v1536_v37 = vpop.f32.mrb[1].mxu0  ;;  %v854_v35 = vld [vmem:[#allocation2] sm:$0xc0] }
 0x206   : > { %v680_v38 = vpop.f32.mrb[2].mxu0 }
 0x207   : > { %v681_v39 = vadd.f32 %v1472_v34, %v680_v38  ;;  %v1537_v40 = vpop.f32.mrb[3].mxu0  ;;  %v684_v41 = vmax.f32 %v678_v36, 0.0 }
 0x209   : > { %v685_v42 = vmax.f32 %v681_v39, 0.0 }
 0x20b   : > { %v741_v43 = vpack.c.bf16 %v685_v42, %v684_v41 }
 0x20d   : > { %742 = vst.msk [vmem:[#allocation2 + $0x8] sm:$0xff] %vm611_vm6, %v741_v43 }
 0x214   : > { %v745_v47 = vld [vmem:[#allocation2 + $0x8] sm:$0xff] }
 0x215   : > { %v750_v49 = vshll.u32 %v745_v47, 16  ;;  %v754_v53 = vshrl.u32 %v745_v47, 16  ;;  %v762_v55 = vrot.slane %v745_v47, 1  ;;  %v744_v58 = vld [vmem:[#allocation2 + $0x8] sm:$0x7f] }
 0x217   : > { %v752_v51 = vrot.slane %v750_v49, 1  ;;  %v1481_v49 = vld [vmem:[%s2123_s8] ss:$0 sm:$0xff] }
 0x219   : > { %v753_v52 = vsel %vm586_vm5, %v747_v48, %v752_v51  ;;  %v756_v54 = vor.u32 %v754_v53, %v752_v51 }
 0x21a   : > { %757 = vrot.lane.b32.xlu1 %v753_v52, %s2134_s23 }
 0x21e   : > { %759 = vrot.lane.b32.xlu1 %v756_v54, %s2134_s23 }
 0x222   : > { %763 = vrot.lane.b32.xlu1 %v762_v55, %s1726_s22 }
 0x28c   : > { %v758_v56 = vpop.permute.xlu1 %757 }
 0x28d   : > { %v766_v59 = vsel %vm611_vm6, %v743_v45, %v758_v56 }
 0x290   : > { %v760_v57 = vpop.permute.xlu1 %759 }
 0x291   : > { %v769_v60 = vsel %vm611_vm6, %v744_v58, %v760_v57  ;;  %v1648_v58 = vld [vmem:[%s2124_s9] sm:$0xff]  }
 0x294   : > { %v764_v61 = vpop.permute.xlu1 %763 }
 0x295   : > { %v771_v62 = vsel %vm545_vm2, %v766_v59, %v764_v61  ;;  %v772_v63 = vsel %vm545_vm2, %v769_v60, %v764_v61  ;;  %v1649_v60 = vld [vmem:[%s2124_s9 + $0x8] sm:$0xff]   ;;  %v1650_v61 = vld [vmem:[%s2124_s9 + $0x10] sm:$0xff]  }
 0x296   : > { %v785_v0 = vrot.slane %v771_v62, 7  ;;  %v786_v1 = vrot.slane %v772_v63, 7  ;;  %v1015_v62 = vld [vmem:[#allocation2] sm:$0x80] }
 0x298   : > { %v787_v3 = vsel %vm626_vm7, %v785_v0, %v786_v1  ;;  %v1020_v1 = vrot.slane %v1015_v62, 1 }
 0x299   : > { %1549 = vmatmul.mubr.msk.bf16.vlgmr.msra.gmra.mrb[4].mxu0 %vm797_vm10, %v787_v3 }
 0x29a   : > { %1562 = vmatprep.mubr.msk.bf16.mxu0 %vm1722_vm1, %v1721_v2  ;;  %1561 = vmatpush3.bf16.msra.mxu0 %v968_v5 }
 0x29b   : > { %1576 = vmatprep.subr.bf16.mxu0 %v1721_v2 }
 0x36c   : > { %v839_v8 = vpop.f32.mrb[4].mxu0 }
 0x36d   : > { %v840_v9 = vadd.f32 %v1477_v6, %v839_v8  ;;  %v1550_v10 = vpop.f32.mrb[5].mxu0  ;;  %v1013_v8 = vld [vmem:[#allocation2] sm:$0xc0] }
 0x36e   : > { %v842_v11 = vpop.f32.mrb[6].mxu0 }
 0x36f   : > { %v846_v13 = vmax.f32 %v840_v9, 0.0  ;;  %v843_v14 = vadd.f32 %v1477_v6, %v842_v11  ;;  %v1551_v15 = vpop.f32.mrb[7].mxu0 }
 0x371   : > { %v848_v17 = vadd.f32 %v846_v13, %v735_v12  ;;  %v847_v18 = vmax.f32 %v843_v14, 0.0 }
 0x373   : > { %v849_v19 = vadd.f32 %v847_v18, %v738_v16  ;;  %v850_v20 = vmax.f32 %v848_v17, 0.0  ;;  %v1651_v18 = vld [vmem:[%s2128_s13] sm:$0xff]  }
 0x375   : > { %v851_v21 = vmax.f32 %v849_v19, 0.0  ;;  %v1487_v19 = vld [vmem:[%s2125_s10] ss:$0 sm:$0xff] }
 0x377   : > { %v852_v22 = vpack.c.bf16 %v851_v21, %v850_v20  ;;  %v1485_v20 = vld [vmem:[%s2127_s12] ss:$0 sm:$0xff] }
 0x379   : > { %853 = vst.msk [vmem:[#allocation2 + $0x8] sm:$0xff] %vm611_vm6, %v852_v22 }
 0x380   : > { %v858_v27 = vld [vmem:[#allocation2 + $0x8] sm:$0xff] }
 0x381   : > { %v857_v28 = vld [vmem:[#allocation2 + $0x8] sm:$0x7f]  ;;  %1563 = vmatmul.mubr.msk.bf16.vlgmr.msra.gmra.mrb[8].mxu0 %vm611_vm6, %v858_v27  ;;  %v870_v32 = vrot.slane %v858_v27, 2 }
 0x382   : > { %v863_v29 = vrot.slane %v857_v28, 1  ;;  %1582 = vmatprep.mubr.msk.bf16.mxu0 %vm1722_vm1, %v1721_v2  ;;  %v855_v36 = vld [vmem:[#allocation2 + $0x8] sm:$0x3f]  ;;  %1577 = vmatpush3.bf16.msra.mxu0 %v1651_v18 }
 0x383   : > { %1578 = vmatprep.subr.bf16.mxu0 %v1721_v2 }
 0x384   : > { %867 = vrot.lane.b32.xlu1 %v863_v29, %s2134_s23  ;;  %v864_v31 = vsel %vm861_vm11, %v862_v30, %v863_v29 }
 0x388   : > { %865 = vrot.lane.b32.xlu1 %v864_v31, %s2134_s23  ;;  %s537_s23 = sand.u32 1, %s1711_s25  }
 0x389   : > { %s1470_s30 = sshll.u32 %s537_s23, 4  ;;  %s2073_s2 = scalar_lea.sflag [#allocation4], %s537_s23 }
 0x38a   : > { %s539_s18 = scalar_lea.vmem [#allocation3], %s1470_s30 }
 0x38b   : > { %s1404_s26 = sshll.u32 %s539_s18, 4  ;;  %s2065_s26 = int_to_ptr.vmem [resolvable:$true] %s1404_s26 }
 0x38c   : > { %871 = vrot.lane.b32.xlu1 %v870_v32, %s1726_s22  ;;  %s1657_s30 = scalar_lea.vmem %s2065_s26, 256  ;;  %p1664_p0 = scmp.lt.s32.totalorder %s2065_s26, %s1662_s3 }
 0x38d   : > { %p1658_p11 = scmp.ne.s32.totalorder %s2065_s26, %s1657_s30  ;;  %p1665_p1 = scmp.lt.s32.totalorder %s1663_s4, %s1657_s30 }
 0x38f   : > { %p1659_p12 = pnand %p1658_p11, %p1858_p5  ;;  %p1666_p2 = por %p1665_p1, %p1664_p0 }
 0x391   : > { %p1660_p13 = pneg %p1659_p12 }
 0x393   : > { %p1667_p3 = pnand %p1666_p2, %p1660_p13 }
 0x3f6   : > { %v868_v33 = vpop.permute.xlu1 %867 }
 0x3f7   : > { %v878_v37 = vsel %vm611_vm6, %v855_v36, %v868_v33  ;;  %v1652_v36 = vld [vmem:[%s2128_s13 + $0x8] sm:$0xff]  }
 0x3f8   : > { %1579 = vmatpush3.bf16.msra.mxu0 %v1652_v36 }
 0x3f9   : > { %1580 = vmatprep.subr.bf16.mxu0 %v1721_v2 }
 0x3fa   : > { %v866_v34 = vpop.permute.xlu1 %865 }
 0x3fb   : > { %v875_v38 = vsel %vm611_vm6, %v854_v35, %v866_v34 }
 0x3fe   : > { %v872_v39 = vpop.permute.xlu1 %871 }
 0x3ff   : > { %v880_v40 = vsel %vm545_vm2, %v875_v38, %v872_v39  ;;  %v881_v41 = vsel %vm545_vm2, %v878_v37, %v872_v39  ;;  %v1653_v37 = vld [vmem:[%s2128_s13 + $0x10] sm:$0xff]   ;;  %v1132_v38 = vld [vmem:[#allocation2] sm:$0xc0] }
 0x400   : > { %v895_v42 = vrot.slane %v880_v40, 6  ;;  %v896_v43 = vrot.slane %v881_v41, 6  ;;  %1581 = vmatpush3.bf16.msra.mxu0 %v1653_v37  ;;  %v1138_v39 = vrot.slane %v1132_v38, 2 }
 0x402   : > { %v897_v44 = vsel %vm696_vm0, %v895_v42, %v896_v43 }
 0x403   : > { %1557 = vmatmul.mubr.msk.bf16.vlgmr.msra.gmra.mrb[4].mxu1 %vm797_vm10, %v897_v44 }
 0x404   : > { %1572 = vmatprep.mubr.msk.bf16.mxu1 %vm1722_vm1, %v1721_v2  ;;  %1567 = vmatpush3.bf16.msra.mxu1 %v1648_v58  ;;  %v1492_v58 = vld [vmem:[%s2129_s14] ss:$0 sm:$0xff] }
 0x405   : > { %1568 = vmatprep.subr.bf16.mxu1 %v1721_v2 }
 0x408   : > { %1569 = vmatpush3.bf16.msra.mxu1 %v1649_v60 }
 0x409   : > { %1570 = vmatprep.subr.bf16.mxu1 %v1721_v2 }
 0x40c   : > { %1571 = vmatpush3.bf16.msra.mxu1 %v1650_v61 }
 0x40d   : > { %1586 = vmatprep.subr.bf16.mxu1 %v1721_v2 }
 0x454   : > { %v1004_v45 = vpop.f32.mrb[8].mxu0 }
 0x455   : > { %v1564_v46 = vpop.f32.mrb[9].mxu0  ;;  %v1005_v25 = vadd.f32 %v1485_v20, %v1004_v45  ;;  %v1130_v45 = vld [vmem:[#allocation2] sm:$0xf0] }
 0x456   : > { %v1007_v47 = vpop.f32.mrb[10].mxu0 }
 0x457   : > { %v1565_v48 = vpop.f32.mrb[11].mxu0  ;;  %v1008_v29 = vadd.f32 %v1485_v20, %v1007_v47 }
 0x4d6   : > { %v947_v50 = vpop.f32.mrb[4].mxu1 }
 0x4d7   : > { %v948_v51 = vadd.f32 %v1481_v49, %v947_v50  ;;  %v1558_v52 = vpop.f32.mrb[5].mxu1 }
 0x4d8   : > { %v950_v53 = vpop.f32.mrb[6].mxu1 }
 0x4d9   : > { %v951_v54 = vadd.f32 %v1481_v49, %v950_v53  ;;  %v1559_v55 = vpop.f32.mrb[7].mxu1  ;;  %v954_v56 = vmax.f32 %v948_v51, 0.0 }
 0x4db   : > { %v955_v57 = vmax.f32 %v951_v54, 0.0 }
 0x4dd   : > { %v1011_v59 = vpack.c.bf16 %v955_v57, %v954_v56  ;;  %v1654_v57 = vld [vmem:[%s2130_s15] sm:$0xff]  }
 0x4df   : > { %1012 = vst.msk [vmem:[#allocation2 + $0x8] sm:$0xff] %vm545_vm2, %v1011_v59 }
 0x4e6   : > { %v1016_v63 = vld [vmem:[#allocation2 + $0x8] sm:$0x7f] }
 0x4e7   : > { %v1021_v0 = vrot.slane %v1016_v63, 1  ;;  %v1017_v4 = vld [vmem:[#allocation2 + $0x8] sm:$0xff] }
 0x4e8   : > { %v1028_v5 = vrot.slane %v1017_v4, 2  ;;  %v1014_v9 = vld [vmem:[#allocation2 + $0x8] sm:$0x3f] }
 0x4e9   : > { %1025 = vrot.lane.b32.xlu1 %v1021_v0, %s1726_s22  ;;  %v1022_v3 = vsel %vm861_vm11, %v1020_v1, %v1021_v0  ;;  %v1655_v4 = vld [vmem:[%s2130_s15 + $0x8] sm:$0xff]  }
 0x4ed   : > { %1023 = vrot.lane.b32.xlu1 %v1022_v3, %s1726_s22 }
 0x4f1   : > { %1029 = vrot.lane.b32.xlu1 %v1028_v5, %s1727_s29 }
 0x55b   : > { %v1026_v6 = vpop.permute.xlu1 %1025 }
 0x55c   : > { %v1036_v10 = vsel %vm545_vm2, %v1014_v9, %v1026_v6  ;;  %v1656_v6 = vld [vmem:[%s2130_s15 + $0x10] sm:$0xff]  }
 0x55f   : > { %v1024_v7 = vpop.permute.xlu1 %1023 }
 0x560   : > { %v1033_v11 = vsel %vm545_vm2, %v1013_v8, %v1024_v7  ;;  %v1245_v7 = vld [vmem:[#allocation2] sm:$0xc0] }
 0x561   : > { %v1250_v8 = vrot.slane %v1245_v7, 2 }
 0x563   : > { %v1030_v12 = vpop.permute.xlu1 %1029 }
 0x564   : > { %v1039_v13 = vsel %vm1037_vm12, %v1033_v11, %v1030_v12  ;;  %v1040_v14 = vsel %vm1037_vm12, %v1036_v10, %v1030_v12 }
 0x565   : > { %v1056_v15 = vrot.slane %v1039_v13, 6  ;;  %v1057_v16 = vrot.slane %v1040_v14, 6 }
 0x567   : > { %v1058_v17 = vsel %vm696_vm0, %v1056_v15, %v1057_v16  ;;  %v1243_v15 = vld [vmem:[#allocation2] sm:$0xf0] }
 0x568   : > { %1573 = vmatmul.mubr.msk.bf16.vlgmr.msra.gmra.mrb[8].mxu1 %vm1077_vm13, %v1058_v17 }
 0x569   : > { %1592 = vmatprep.mubr.msk.bf16.mxu1 %vm1722_vm1, %v1721_v2  ;;  %1587 = vmatpush3.bf16.msra.mxu1 %v1654_v57 }
 0x56a   : > { %1588 = vmatprep.subr.bf16.mxu1 %v1721_v2 }
 0x56d   : > { %1589 = vmatpush3.bf16.msra.mxu1 %v1655_v4 }
 0x56e   : > { %1590 = vmatprep.subr.bf16.mxu1 %v1721_v2 }
 0x571   : > { %1591 = vmatpush3.bf16.msra.mxu1 %v1656_v6 }
 0x63b   : > { %v1115_v21 = vpop.f32.mrb[8].mxu1 }
 0x63c   : > { %v1116_v22 = vadd.f32 %v1487_v19, %v1115_v21  ;;  %v1574_v23 = vpop.f32.mrb[9].mxu1 }
 0x63d   : > { %v1118_v24 = vpop.f32.mrb[10].mxu1 }
 0x63e   : > { %v1122_v26 = vmax.f32 %v1116_v22, 0.0  ;;  %v1119_v27 = vadd.f32 %v1487_v19, %v1118_v24  ;;  %v1575_v28 = vpop.f32.mrb[11].mxu1 }
 0x640   : > { %v2002_v30 = vadd.f32 %v1122_v26, %v1005_v25  ;;  %v1123_v31 = vmax.f32 %v1119_v27, 0.0  ;;  %v1497_v25 = vld [vmem:[%s2131_s16] ss:$0 sm:$0xff] }
 0x642   : > { %v2004_v32 = vadd.f32 %v1123_v31, %v1008_v29  ;;  %v1126_v33 = vmax.f32 %v2002_v30, 0.0 }
 0x644   : > { %v1127_v34 = vmax.f32 %v2004_v32, 0.0 }
 0x646   : > { %v1128_v35 = vpack.c.bf16 %v1127_v34, %v1126_v33 }
 0x648   : > { %1129 = vst.msk [vmem:[#allocation2 + $0x8] sm:$0xff] %vm545_vm2, %v1128_v35 }
 0x64f   : > { %v1134_v40 = vld [vmem:[#allocation2 + $0x8] sm:$0xff] }
 0x650   : > { %v1133_v41 = vld [vmem:[#allocation2 + $0x8] sm:$0x3f]  ;;  %v1146_v42 = vrot.slane %v1134_v40, 4 }
 0x651   : > { %v1139_v43 = vrot.slane %v1133_v41, 2  ;;  %v1131_v51 = vld [vmem:[#allocation2 + $0x8] sm:$0xf] }
 0x652   : > { %1147 = vrot.lane.b32.xlu0 %v1146_v42, %s1727_s29 }
 0x653   : > { %v1140_v44 = vsel %vm639_vm4, %v1138_v39, %v1139_v43 }
 0x654   : > { %1141 = vrot.lane.b32.xlu1 %v1140_v44, %s1726_s22 }
 0x658   : > { %1143 = vrot.lane.b32.xlu1 %v1139_v43, %s1726_s22 }
 0x6c4   : > { %v1148_v48 = vpop.permute.xlu0 %1147 }
 0x6c6   : > { %v1142_v46 = vpop.permute.xlu1 %1141 }
 0x6c7   : > { %v1151_v47 = vsel %vm545_vm2, %v1130_v45, %v1142_v46 }
 0x6c8   : > { %v1156_v49 = vsel %vm1037_vm12, %v1151_v47, %v1148_v48 }
 0x6c9   : > { %v1174_v54 = vrot.slane %v1156_v49, 4 }
 0x6ca   : > { %v1144_v50 = vpop.permute.xlu1 %1143 }
 0x6cb   : > { %v1154_v52 = vsel %vm545_vm2, %v1131_v51, %v1144_v50 }
 0x6cc   : > { %v1157_v53 = vsel %vm1037_vm12, %v1154_v52, %v1148_v48 }
 0x6cd   : > { %v1175_v55 = vrot.slane %v1157_v53, 4 }
 0x6cf   : > { %v1176_v56 = vsel %vm801_vm9, %v1174_v54, %v1175_v55 }
 0x6d0   : > { %1583 = vmatmul.mubr.msk.bf16.vlgmr.msra.gmra.mrb[12].mxu0 %vm1077_vm13, %v1176_v56 }
 0x7a3   : > { %v1232_v59 = vpop.f32.mrb[12].mxu0 }
 0x7a4   : > { %v1233_v60 = vadd.f32 %v1492_v58, %v1232_v59  ;;  %v1584_v61 = vpop.f32.mrb[13].mxu0 }
 0x7a5   : > { %v1235_v62 = vpop.f32.mrb[14].mxu0 }
 0x7a6   : > { %v1236_v63 = vadd.f32 %v1492_v58, %v1235_v62  ;;  %v1585_v0 = vpop.f32.mrb[15].mxu0  ;;  %v1239_v1 = vmax.f32 %v1233_v60, 0.0 }
 0x7a8   : > { %v1240_v3 = vmax.f32 %v1236_v63, 0.0 }
 0x7aa   : > { %v1241_v5 = vpack.c.bf16 %v1240_v3, %v1239_v1 }
 0x7ac   : > { %1242 = vst.msk [vmem:[#allocation2 + $0x8] sm:$0xff] %vm545_vm2, %v1241_v5 }
 0x7b3   : > { %v1246_v9 = vld [vmem:[#allocation2 + $0x8] sm:$0x3f] }
 0x7b4   : > { %v1251_v10 = vrot.slane %v1246_v9, 2  ;;  %v1247_v12 = vld [vmem:[#allocation2 + $0x8] sm:$0xff] }
 0x7b5   : > { %v1258_v13 = vrot.slane %v1247_v12, 4  ;;  %v1244_v16 = vld [vmem:[#allocation2 + $0x8] sm:$0xf] }
 0x7b6   : > { %1255 = vrot.lane.b32.xlu0 %v1251_v10, %s1726_s22  ;;  %v1252_v11 = vsel %vm639_vm4, %v1250_v8, %v1251_v10 }
 0x7b7   : > { %1253 = vrot.lane.b32.xlu1 %v1252_v11, %s1726_s22 }
 0x7bb   : > { %1259 = vrot.lane.b32.xlu1 %v1258_v13, %s1727_s29  ;;  %s2070_s29 = scalar_lea.hbm %s2132_s17, %s1507_s19 }
 0x828   : > { %v1256_v14 = vpop.permute.xlu0 %1255 }
 0x829   : > { %v1254_v2 = vpop.permute.xlu1 %1253  ;;  %v1266_v17 = vsel %vm545_vm2, %v1244_v16, %v1256_v14 }
 0x82a   : > { %v1263_v18 = vsel %vm545_vm2, %v1243_v15, %v1254_v2 }
 0x82d   : > { %v1260_v19 = vpop.permute.xlu1 %1259 }
 0x82e   : > { %v1268_v20 = vsel %vm1037_vm12, %v1263_v18, %v1260_v19  ;;  %v1269_v21 = vsel %vm1037_vm12, %v1266_v17, %v1260_v19 }
 0x82f   : > { %v1285_v22 = vrot.slane %v1268_v20, 4  ;;  %v1286_v23 = vrot.slane %v1269_v21, 4 }
 0x831   : > { %v1287_v24 = vsel %vm801_vm9, %v1285_v22, %v1286_v23 }
 0x832   : > { %1593 = vmatmul.mubr.msk.bf16.vlgmr.msra.gmra.mrb[12].mxu1 %vm1077_vm13, %v1287_v24 }
 0x905   : > { %v1343_v26 = vpop.f32.mrb[12].mxu1 }
 0x906   : > { %v1344_v27 = vadd.f32 %v1497_v25, %v1343_v26  ;;  %v1594_v28 = vpop.f32.mrb[13].mxu1 }
 0x907   : > { %v1346_v29 = vpop.f32.mrb[14].mxu1 }
 0x908   : > { %v1350_v31 = vmax.f32 %v1344_v27, 0.0  ;;  %v1347_v35 = vadd.f32 %v1497_v25, %v1346_v29  ;;  %v1595_v36 = vpop.f32.mrb[15].mxu1 }
 0x90a   : > { %v1352_v37 = vadd.f32 %v1350_v31, %v1126_v33  ;;  %v1351_v38 = vmax.f32 %v1347_v35, 0.0 }
 0x90c   : > { %v1354_v39 = vmax.f32 %v1352_v37, 0.0  ;;  %v1353_v40 = vadd.f32 %v1351_v38, %v1127_v34 }
 0x90e   : > { %1356 = vxpose.xlu0.b32.start [1/2] (short) (narrow) %v1354_v39, 16  ;;  %v1355_v41 = vmax.f32 %v1353_v40, 0.0 }
 0x912   : > { %1357 = vxpose.xlu0.b32.end [2/2] (short) (narrow) %v1355_v41, 16 }
 0x98e   : > { %v1372_v42 = vpop.trf.xlu0 }
 0x98f   : > { %1388 = vst.msk [vmem:[%s539_s18] sm:$0xff] %vm545_vm2, %v1372_v42 }
 0x992   : > { %v1373_v30 = vpop.trf.xlu0 }
 0x993   : > { %1389 = vst.msk [vmem:[%s539_s18 + $0x8] sm:$0xff] %vm545_vm2, %v1373_v30 }
 0x994   : > { %1670 = shalt.err (!%p1667_p3)
}
 0x995   : > { %s1671_s23 = scalar_lea.hbm %s2070_s29, 256  ;;  %s1675_s21 = scalar_lea.hbm %s2132_s17, 512 }
 0x996   : > { %p1672_p4 = scmp.ne.s32.totalorder %s2070_s29, %s1671_s23  ;;  %p1676_p9 = scmp.lt.u32.totalorder %s2070_s29, %s2132_s17 }
 0x997   : > { %p1677_p10 = scmp.lt.u32.totalorder %s1675_s21, %s1671_s23  ;;  %p1679_p12 = scmp.lt.u32.totalorder %s1671_s23, %s2070_s29 }
 0x998   : > { %p1673_p7 = pnand %p1672_p4, %p1858_p5 }
 0x999   : > { %p1678_p11 = por %p1677_p10, %p1676_p9 }
 0x99a   : > { %p1674_p8 = pneg %p1673_p7 }
 0x99b   : > { %p1680_p13 = por %p1679_p12, %p1678_p11 }
 0x99d   : > { %p1681_p0 = pnand %p1680_p13, %p1674_p8 }
 0x99f   : > { %1684 = shalt.err (!%p1681_p0)
}
 0x9a0   : > { %s1729_s4 = smov 128   ;;  %s2149_s30 = smov 8  }
 0x9a1   : > { %1596 = dma.vmem_to_hbm [thread:$0]  (%p1858_p5), %s2065_s26, 256, %s2070_s29, %s2073_s2, %s1729_s4, %s1729_s4, %s2149_s30  }
 0x9a2 PF: > { %p1602_p1 = scmp.ge.s32.totalorder %s1719_s27, 2  ;;  %s1419_s28 = sand.u32 1, %s1707_s24  }
 0x9a3   : > { %s1420_s23 = scalar_lea.sflag [#allocation4], %s1419_s28 }
 0x9a4   : > { %p1599_p2 = pnand %p1602_p1, %p1862_p6 }
 0x9a6   : > { %1702 = dma.done.wait (!%p1599_p2), %s1420_s23, 256  }
 0x9a7   : > { %1704 = vsyncadd (!%p1599_p2), %s1420_s23, 4294967040  ;;  %s2150_s18 = sld [smem:[#allocation6_spill]]  ;;  %s2151_s26 = sld [smem:[#allocation7_spill]] }
 0x9a8   : > { %p27_p3 = scmp.ge.s32.totalorder %s1845_s0, 4   ;;  %s2152_s24 = smov %s1711_s25 }
 0x9a9   : > { %s2154_s27 = smov %s1845_s0 }
 0x9aa   :  { %29 = sbr.rel (!%p27_p3) target bundleno = 9 (0x9), region = 123 }
 0x9ad   : > { %s2153_s25 = smov %s2150_s18 }
 0x9b1   :  { %1425 = vsyncpa [#allocation4], 1 }
 0x9b2   :  { %1427 = vsyncpa [#allocation4 + $0x1], 1 }

</bundles_post_ra>
